<compile_context>
chip_gen: v7x
topology: tpu7x:2x2x1
jax: 0.10.0
libtpu: 0.0.40
codegen_flags: <defaults>
</compile_context>

<pallas_src>
import numpy as np
import jax
import jax.numpy as jnp
from jax import lax
from jax.experimental import pallas as pl
from jax.experimental.pallas import tpu as pltpu

# --- saturation pressure table (temperature [C], pressure) -------------------
_TEM_SAT_PRESS = [
    [-62, 13.9], [-60, 15.9], [-58, 18.1], [-56, 20.5], [-54, 23.2], [-52, 26.2],
    [-50, 29.5], [-48, 33.1], [-46, 37.0], [-44, 41.3], [-42, 46.1], [-40, 51.2],
    [-38, 56.8], [-36, 62.9], [-34, 69.5], [-32, 76.7], [-30, 84.4], [-28, 92.7],
    [-26, 101.7], [-24, 111.3], [-22, 121.6], [-20, 132.7], [-18, 144.6],
    [-16, 157.3], [-14, 170.8], [-12, 185.2], [-10, 200.6], [-8, 216.9],
    [-6, 234.3], [-4, 252.7], [-2, 272.2], [0, 292.8], [2, 314.6], [4, 337.7],
    [6, 362.0], [8, 387.6], [10, 414.6], [12, 443.0], [14, 472.9], [16, 504.3],
    [18, 537.2], [20, 571.7], [22, 607.9], [24, 645.8], [26, 685.4], [28, 726.9],
    [30, 770.2], [32, 815.4], [34, 862.6], [36, 911.8], [38, 963.2], [40, 1016.6],
    [42, 1072.2], [44, 1130.1], [46, 1190.3], [48, 1252.9], [50, 1317.9],
    [52, 1385.4], [54, 1455.5], [56, 1528.2], [58, 1603.6], [60, 1681.8],
    [62, 1762.8], [64, 1846.7], [66, 1933.7], [68, 2023.7], [70, 2116.8],
    [72, 2213.2], [74, 2313.0], [76, 2416.1], [78, 2522.8], [80, 2633.2],
    [82, 2747.3], [84, 2865.3], [86, 2987.4], [88, 3113.6], [90, 3244.2],
    [92, 3379.3], [94, 3519.3], [96, 3664.5],
]
NTAB = len(_TEM_SAT_PRESS)      # 79 table rows -> 78 linear segments
NSEG = NTAB - 1
SEG_PAD = 128                   # pad segments to one full sublane group of 128
_BIG = 1.0e30                   # finite sentinel (avoids inf arithmetic)


def _round_up(n, m):
    return ((n + m - 1) // m) * m


def _tpu_vmem_capacity_bytes():
    try:
        info = pltpu.get_tpu_info()
        v = getattr(info, "vmem_capacity_bytes", None)
        if v:
            return int(v)
    except Exception:
        pass
    return 128 << 20  # conservative default (v5e/v6e)


# --- stage 1: per-output-column coefficients, lane-dense (O(B) work) ----------
def _make_coef_kernel(batch, tcn):
    """Closure over static batch size and column-tile width."""

    def coef_kernel(s_ref, hp_ref, air_ref, lo_ref, hi_ref, sl_ref, sb_ref,
                    a_ref, b_ref, t_ref):
        # s_ref   : (1, 1)       SMEM  S = (1+K1)/(K0+K1)
        # hp_ref  : (1, TCN)     hi_pressure at cols 1..B (filler elsewhere)
        # air_ref : (1, TCN)     x[:,0] at cols 1..B (filler elsewhere)
        # lo_ref  : (128, 1)     segment lower bounds (lo[0]=-BIG, pads=+BIG)
        # hi_ref  : (128, 1)     segment upper bounds (hi[last]=+BIG, pads=-BIG)
        # sl_ref  : (128, 1)     segment slopes       (pads = 0)
        # sb_ref  : (128, 1)     segment intercepts   (pads = 0)
        # a_ref, b_ref, t_ref : (1, TCN) outputs
        S = s_ref[0, 0]
        hp = hp_ref[...]                                          # (1, TCN)
        # clipped searchsorted-left: segment k active iff lo[k] < hp <= hi[k]
        mask = (hp > lo_ref[...]) & (hp <= hi_ref[...])           # (128, TCN)
        slope_sel = jnp.sum(jnp.where(mask, sl_ref[...], 0.0),
                            axis=0, keepdims=True)                # (1, TCN)
        segb_sel = jnp.sum(jnp.where(mask, sb_ref[...], 0.0),
                           axis=0, keepdims=True)                 # (1, TCN)

        col = (lax.broadcasted_iota(jnp.int32, (1, tcn), 1)
               + pl.program_id(0) * tcn)                          # global column
        is_com = (col >= 1) & (col <= batch)                      # Com_Out_Temp cols
        is_hp = col == batch + 1                                  # hi_pressure col
        is_p5 = col == 0                                          # temp_p_h_5 col

        a_ref[...] = (jnp.where(is_com, S * slope_sel, 0.0)
                      + jnp.where(is_hp, 1.0, 0.0))
        b_ref[...] = jnp.where(is_com,
                               S * segb_sel + (1.0 - S) * air_ref[...], 0.0)
        t_ref[...] = jnp.where(is_p5, 1.0, 0.0)

    return coef_kernel


# --- stage 2: lane-dense streaming outer-product FMA (O(B^2) work) ------------
def fma_kernel(hp_ref, p5_ref, a_ref, b_ref, t_ref, out_ref):
    """out[i, c] = hp[i]*a[c] + temp_p_h_5[i]*t[c] + b[c]"""
    out_ref[...] = (hp_ref[...] * a_ref[...]
                    + p5_ref[...] * t_ref[...]
                    + b_ref[...])


# --- model wrapper ------------------------------------------------------------
class MyModelPallas:
    def __init__(self, key):
        kt_key, kk_key = jax.random.split(key)
        # Com_Out_Temp_model parameters
        self.lamuda1 = jnp.float32(300.0)
        self.lamuda2 = jnp.float32(500.0)
        self.k_t = jax.random.normal(kt_key, (1, 1), jnp.float32)  # dead-code path
        self.k_k = jax.random.normal(kk_key, (1, 1), jnp.float32)
        # MLPModel parameters are never used by MyModel.forward -> omitted.

        # host-precomputed segment tables, padded to 128 (live on sublanes)
        tab = np.asarray(_TEM_SAT_PRESS, dtype=np.float32)
        tt, tp = tab[:, 0], tab[:, 1]
        slope = (tt[1:] - tt[:-1]) / (tp[1:] - tp[:-1])            # (NSEG,)
        segb = tt[:-1] - tp[:-1] * slope                           # (NSEG,)

        lo = np.full((SEG_PAD,), _BIG, np.float32)
        lo[0] = -_BIG
        lo[1:NSEG] = tp[1:NSEG]
        hi = np.full((SEG_PAD,), -_BIG, np.float32)
        hi[:NSEG - 1] = tp[1:NSEG]
        hi[NSEG - 1] = _BIG
        sl = np.zeros((SEG_PAD,), np.float32)
        sl[:NSEG] = slope
        sb = np.zeros((SEG_PAD,), np.float32)
        sb[:NSEG] = segb

        self.tab_lo = jnp.asarray(lo).reshape(SEG_PAD, 1)
        self.tab_hi = jnp.asarray(hi).reshape(SEG_PAD, 1)
        self.tab_sl = jnp.asarray(sl).reshape(SEG_PAD, 1)
        self.tab_sb = jnp.asarray(sb).reshape(SEG_PAD, 1)

        self._vmem_cap = _tpu_vmem_capacity_bytes()
        self._forward = jax.jit(self._forward_impl)

    def __call__(self, x, temp_p_h_5, hi_pressure):
        return self._forward(x, temp_p_h_5, hi_pressure)

    def _forward_impl(self, x, temp_p_h_5, hi_pressure):
        f = jnp.float32
        x = x.astype(f)
        temp_p_h_5 = temp_p_h_5.astype(f)
        hi_pressure = hi_pressure.astype(f)

        B = x.shape[0]
        C = B + 2          # [temp_p_h_5 | Com_Out_Temp (BxB) | hi_pressure]
        # x1 = x[:, [0,1,2,3,4,5,7,9]] is sliced but unused in the torch forward.

        # ---- tile selection (HBM-write-bound: pad columns only to 128, keep
        #      the column axis whole unless the tile blows the VMEM budget) ----
        small_vmem = self._vmem_cap <= (64 << 20)                  # v7x-class chip
        out_tile_bytes = (8 << 20) if small_vmem else (4 << 20)
        budget_elems = out_tile_bytes // 4

        cpad128 = _round_up(C, 128)
        TN = min(cpad128, max(128, (budget_elems // 8) // 128 * 128))
        TM = min(_round_up(B, 8), max(8, (budget_elems // TN) // 8 * 8))
        # guarantee >= 2 parallel grid steps when possible (v7x: 2 TensorCores)
        if pl.cdiv(B, TM) * pl.cdiv(C, TN) < 2 and B > 8:
            TM = _round_up(pl.cdiv(B, 2), 8)
        n_row_blocks = pl.cdiv(B, TM)
        n_col_blocks = pl.cdiv(C, TN)
        Cpad = n_col_blocks * TN        # width of the lane-dense coefficient rows

        # ---- scalar S and the two lane-dense metadata rows (O(B) glue) -------
        K0 = jnp.clip(self.lamuda1 / self.lamuda2, 0.0001, 1.0)
        K1 = jnp.clip(1.0 - self.k_k[0, 0], 0.0001, 1.0)
        S = ((1.0 + K1) / (K0 + K1)).astype(f).reshape(1, 1)

        # column c (1..B) corresponds to sample c-1; filler 0 elsewhere is safe
        # because the in-kernel column selectors zero those contributions.
        hp_row = jnp.pad(hi_pressure[:, 0], (1, Cpad - B - 1)).reshape(1, Cpad)
        air_row = jnp.pad(x[:, 0], (1, Cpad - B - 1)).reshape(1, Cpad)

        # ---- stage 1: coefficients a[c], b[c], t[c] (usually a single step) --
        TCN = min(Cpad, 2048)
        coef_grid = pl.cdiv(Cpad, TCN)
        a_row, b_row, t_row = pl.pallas_call(
            _make_coef_kernel(B, TCN),
            out_shape=(jax.ShapeDtypeStruct((1, Cpad), f),
                       jax.ShapeDtypeStruct((1, Cpad), f),
                       jax.ShapeDtypeStruct((1, Cpad), f)),
            grid=(coef_grid,),
            in_specs=[
                pl.BlockSpec(memory_space=pltpu.MemorySpace.SMEM),   # S scalar
                pl.BlockSpec((1, TCN), lambda i: (0, i)),            # hp_row
                pl.BlockSpec((1, TCN), lambda i: (0, i)),            # air_row
                pl.BlockSpec((SEG_PAD, 1), lambda i: (0, 0)),        # seg lo
                pl.BlockSpec((SEG_PAD, 1), lambda i: (0, 0)),        # seg hi
                pl.BlockSpec((SEG_PAD, 1), lambda i: (0, 0)),        # seg slope
                pl.BlockSpec((SEG_PAD, 1), lambda i: (0, 0)),        # seg intercept
            ],
            out_specs=(pl.BlockSpec((1, TCN), lambda i: (0, i)),
                       pl.BlockSpec((1, TCN), lambda i: (0, i)),
                       pl.BlockSpec((1, TCN), lambda i: (0, i))),
            compiler_params=pltpu.CompilerParams(
                dimension_semantics=("arbitrary",)),
        )(S, hp_row, air_row, self.tab_lo, self.tab_hi, self.tab_sl, self.tab_sb)

        # ---- stage 2: tiled, lane-dense streaming FMA, exact output shape ----
        est_vmem = 2 * TM * TN * 4 + 4 * TM * 4 + 6 * TN * 4 + (1 << 20)
        cp_kwargs = {}
        if est_vmem > (12 << 20):
            cp_kwargs["vmem_limit_bytes"] = min(int(est_vmem + (4 << 20)), 40 << 20)

        out = pl.pallas_call(
            fma_kernel,
            out_shape=jax.ShapeDtypeStruct((B, C), f),
            grid=(n_row_blocks, n_col_blocks),
            in_specs=[
                pl.BlockSpec((TM, 1), lambda i, j: (i, 0)),   # hi_pressure rows
                pl.BlockSpec((TM, 1), lambda i, j: (i, 0)),   # temp_p_h_5 rows
                pl.BlockSpec((1, TN), lambda i, j: (0, j)),   # a
                pl.BlockSpec((1, TN), lambda i, j: (0, j)),   # b
                pl.BlockSpec((1, TN), lambda i, j: (0, j)),   # t (temp_p_h_5 col)
            ],
            out_specs=pl.BlockSpec((TM, TN), lambda i, j: (i, j)),
            compiler_params=pltpu.CompilerParams(
                dimension_semantics=("parallel", "parallel"), **cp_kwargs),
        )(hi_pressure, temp_p_h_5, a_row, b_row, t_row)

        # kernel already emits the fused (temp_p_h_5 | Com_Out_Temp | hi_pressure)
        # layout at the exact (B, B+2) shape; nothing left to slice.
        return out


# --- pure-numpy reference (mirrors the PyTorch forward) -----------------------
def _reference(x, temp_p_h_5, hi_pressure, k_k):
    tab = np.asarray(_TEM_SAT_PRESS, dtype=np.float32)
    val = np.asarray(hi_pressure, dtype=np.float32)                # (B, 1)
    idx = np.searchsorted(tab[:, 1], val[:, 0], side="left") - 1
    idx = np.clip(idx, 0, tab.shape[0] - 2)
    out1, out2 = tab[idx, 0], tab[idx + 1, 0]
    w1, w2 = tab[idx, 1], tab[idx + 1, 1]
    w = (val - w1) / (w2 - w1)                                     # (B,1)-(B,) -> (B,B)
    temp_high = w * (out2 - out1) + out1 + 273.15
    air = np.asarray(x, dtype=np.float32)[:, 0] + 273.15           # (B,)
    K0 = np.clip(300.0 / 500.0, 1e-4, 1.0)
    K1 = np.clip(1.0 - float(k_k[0, 0]), 1e-4, 1.0)
    diff = temp_high - air
    c1 = diff / (K0 + K1)
    c2 = air + K1 * diff / (K0 + K1)
    com = c1 + c2 - 273.15
    return np.concatenate(
        [np.asarray(temp_p_h_5, np.float32), com.astype(np.float32), val], axis=1)


if __name__ == "__main__":
    key = jax.random.PRNGKey(0)
    k_model, k_data = jax.random.split(key)
    model = MyModelPallas(k_model)

    for B in (8, 13):   # 13 exercises the ragged (masked) edge-tile path
        kx, kp, kh = jax.random.split(jax.random.fold_in(k_data, B), 3)
        x = jax.random.uniform(kx, (B, 10), jnp.float32, minval=-20.0, maxval=40.0)
        temp_p_h_5 = jax.random.uniform(kp, (B, 1), jnp.float32,
                                        minval=-10.0, maxval=60.0)
        hi_pressure = jax.random.uniform(kh, (B, 1), jnp.float32,
                                         minval=50.0, maxval=3500.0)

        out = jax.block_until_ready(model(x, temp_p_h_5, hi_pressure))

        ref = _reference(np.asarray(x), np.asarray(temp_p_h_5),
                         np.asarray(hi_pressure), np.asarray(model.k_k))
        assert out.shape == (B, B + 2), out.shape
        np.testing.assert_allclose(np.asarray(out), ref, rtol=2e-4, atol=5e-3)

    print("KERNEL_OK")
</pallas_src>

<mosaic_0001>
module attributes {stable_mosaic.version = 11 : i64} {
  func.func @coef_kernel(%arg0: i32, %arg1: memref<1x1xf32, #tpu.memory_space<smem>>, %arg2: memref<1x128xf32, #tpu.memory_space<vmem>>, %arg3: memref<1x128xf32, #tpu.memory_space<vmem>>, %arg4: memref<128x1xf32, #tpu.memory_space<vmem>>, %arg5: memref<128x1xf32, #tpu.memory_space<vmem>>, %arg6: memref<128x1xf32, #tpu.memory_space<vmem>>, %arg7: memref<128x1xf32, #tpu.memory_space<vmem>>, %arg8: memref<1x128xf32, #tpu.memory_space<vmem>>, %arg9: memref<1x128xf32, #tpu.memory_space<vmem>>, %arg10: memref<1x128xf32, #tpu.memory_space<vmem>>) attributes {dimension_semantics = [#tpu.dimension_semantics<arbitrary>], iteration_bounds = array<i64: 1>, scalar_prefetch = 0 : i64, scratch_operands = 0 : i64, tpu.core_type = #tpu.core_type<tc>, window_params = [{transform_indices = @transform_0, window_bounds = array<i64: 1, 1>}, {transform_indices = @transform_1, window_bounds = array<i64: 1, 128>}, {transform_indices = @transform_2, window_bounds = array<i64: 1, 128>}, {pipeline_mode = #tpu.pipeline_mode<synchronous>, transform_indices = @transform_3, window_bounds = array<i64: 128, 1>}, {pipeline_mode = #tpu.pipeline_mode<synchronous>, transform_indices = @transform_4, window_bounds = array<i64: 128, 1>}, {pipeline_mode = #tpu.pipeline_mode<synchronous>, transform_indices = @transform_5, window_bounds = array<i64: 128, 1>}, {pipeline_mode = #tpu.pipeline_mode<synchronous>, transform_indices = @transform_6, window_bounds = array<i64: 128, 1>}, {transform_indices = @transform_7, window_bounds = array<i64: 1, 128>}, {transform_indices = @transform_8, window_bounds = array<i64: 1, 128>}, {transform_indices = @transform_9, window_bounds = array<i64: 1, 128>}]} {
    %c0 = arith.constant 0 : index
    %c0_0 = arith.constant 0 : index
    %0 = memref.load %arg1[%c0, %c0_0] : memref<1x1xf32, #tpu.memory_space<smem>>
    %c0_1 = arith.constant 0 : index
    %c0_2 = arith.constant 0 : index
    %1 = vector.load %arg2[%c0_1, %c0_2] : memref<1x128xf32, #tpu.memory_space<vmem>>, vector<1x128xf32>
    %c0_3 = arith.constant 0 : index
    %c0_4 = arith.constant 0 : index
    %2 = vector.load %arg4[%c0_3, %c0_4] : memref<128x1xf32, #tpu.memory_space<vmem>>, vector<128x1xf32>
    %3 = vector.broadcast %1 : vector<1x128xf32> to vector<128x128xf32>
    %4 = vector.broadcast %2 : vector<128x1xf32> to vector<128x128xf32>
    %5 = arith.cmpf ogt, %3, %4 : vector<128x128xf32>
    %c0_5 = arith.constant 0 : index
    %c0_6 = arith.constant 0 : index
    %6 = vector.load %arg5[%c0_5, %c0_6] : memref<128x1xf32, #tpu.memory_space<vmem>>, vector<128x1xf32>
    %7 = vector.broadcast %1 : vector<1x128xf32> to vector<128x128xf32>
    %8 = vector.broadcast %6 : vector<128x1xf32> to vector<128x128xf32>
    %9 = arith.cmpf ole, %7, %8 : vector<128x128xf32>
    %10 = arith.andi %5, %9 : vector<128x128xi1>
    %c0_7 = arith.constant 0 : index
    %c0_8 = arith.constant 0 : index
    %11 = vector.load %arg6[%c0_7, %c0_8] : memref<128x1xf32, #tpu.memory_space<vmem>>, vector<128x1xf32>
    %cst = arith.constant 0.000000e+00 : f32
    %12 = vector.shape_cast %11 : vector<128x1xf32> to vector<128x1xf32>
    %13 = vector.broadcast %12 : vector<128x1xf32> to vector<128x128xf32>
    %14 = vector.broadcast %cst : f32 to vector<128x128xf32>
    %15 = arith.select %10, %13, %14 : vector<128x128xi1>, vector<128x128xf32>
    %cst_9 = arith.constant dense<0.000000e+00> : vector<128xf32>
    %16 = vector.multi_reduction <add>, %15, %cst_9 [0] : vector<128x128xf32> to vector<128xf32>
    %17 = vector.shape_cast %16 : vector<128xf32> to vector<1x128xf32>
    %c0_10 = arith.constant 0 : index
    %c0_11 = arith.constant 0 : index
    %18 = vector.load %arg7[%c0_10, %c0_11] : memref<128x1xf32, #tpu.memory_space<vmem>>, vector<128x1xf32>
    %cst_12 = arith.constant 0.000000e+00 : f32
    %19 = vector.shape_cast %18 : vector<128x1xf32> to vector<128x1xf32>
    %20 = vector.broadcast %19 : vector<128x1xf32> to vector<128x128xf32>
    %21 = vector.broadcast %cst_12 : f32 to vector<128x128xf32>
    %22 = arith.select %10, %20, %21 : vector<128x128xi1>, vector<128x128xf32>
    %cst_13 = arith.constant dense<0.000000e+00> : vector<128xf32>
    %23 = vector.multi_reduction <add>, %22, %cst_13 [0] : vector<128x128xf32> to vector<128xf32>
    %24 = vector.shape_cast %23 : vector<128xf32> to vector<1x128xf32>
    %25 = tpu.iota {dimensions = array<i32: 1>} : vector<1x128xi32>
    %c128_i32 = arith.constant 128 : i32
    %26 = arith.muli %arg0, %c128_i32 : i32
    %27 = vector.broadcast %26 : i32 to vector<1x128xi32>
    %28 = arith.addi %25, %27 : vector<1x128xi32>
    %c1_i32 = arith.constant 1 : i32
    %29 = vector.broadcast %c1_i32 : i32 to vector<1x128xi32>
    %30 = arith.cmpi sge, %28, %29 : vector<1x128xi32>
    %c8_i32 = arith.constant 8 : i32
    %31 = vector.broadcast %c8_i32 : i32 to vector<1x128xi32>
    %32 = arith.cmpi sle, %28, %31 : vector<1x128xi32>
    %33 = arith.andi %30, %32 : vector<1x128xi1>
    %c9_i32 = arith.constant 9 : i32
    %34 = vector.broadcast %c9_i32 : i32 to vector<1x128xi32>
    %35 = arith.cmpi eq, %28, %34 : vector<1x128xi32>
    %c0_i32 = arith.constant 0 : i32
    %36 = vector.broadcast %c0_i32 : i32 to vector<1x128xi32>
    %37 = arith.cmpi eq, %28, %36 : vector<1x128xi32>
    %38 = vector.broadcast %0 : f32 to vector<1x128xf32>
    %39 = arith.mulf %38, %17 : vector<1x128xf32>
    %cst_14 = arith.constant 0.000000e+00 : f32
    %40 = vector.broadcast %cst_14 : f32 to vector<1x128xf32>
    %41 = arith.select %33, %39, %40 : vector<1x128xi1>, vector<1x128xf32>
    %cst_15 = arith.constant 1.000000e+00 : f32
    %cst_16 = arith.constant 0.000000e+00 : f32
    %42 = vector.broadcast %cst_15 : f32 to vector<1x128xf32>
    %43 = vector.broadcast %cst_16 : f32 to vector<1x128xf32>
    %44 = arith.select %35, %42, %43 : vector<1x128xi1>, vector<1x128xf32>
    %45 = arith.addf %41, %44 : vector<1x128xf32>
    %c0_17 = arith.constant 0 : index
    %c0_18 = arith.constant 0 : index
    %46 = vector.load %arg8[%c0_17, %c0_18] : memref<1x128xf32, #tpu.memory_space<vmem>>, vector<1x128xf32>
    tpu.vector_store %arg8[%c0_17, %c0_18], %45 {strides = array<i32>} : memref<1x128xf32, #tpu.memory_space<vmem>>, vector<1x128xf32>,
    %47 = vector.broadcast %0 : f32 to vector<1x128xf32>
    %48 = arith.mulf %47, %24 : vector<1x128xf32>
    %cst_19 = arith.constant 1.000000e+00 : f32
    %49 = arith.subf %cst_19, %0 : f32
    %c0_20 = arith.constant 0 : index
    %c0_21 = arith.constant 0 : index
    %50 = vector.load %arg3[%c0_20, %c0_21] : memref<1x128xf32, #tpu.memory_space<vmem>>, vector<1x128xf32>
    %51 = vector.broadcast %49 : f32 to vector<1x128xf32>
    %52 = arith.mulf %51, %50 : vector<1x128xf32>
    %53 = arith.addf %48, %52 : vector<1x128xf32>
    %cst_22 = arith.constant 0.000000e+00 : f32
    %54 = vector.broadcast %cst_22 : f32 to vector<1x128xf32>
    %55 = arith.select %33, %53, %54 : vector<1x128xi1>, vector<1x128xf32>
    %c0_23 = arith.constant 0 : index
    %c0_24 = arith.constant 0 : index
    %56 = vector.load %arg9[%c0_23, %c0_24] : memref<1x128xf32, #tpu.memory_space<vmem>>, vector<1x128xf32>
    tpu.vector_store %arg9[%c0_23, %c0_24], %55 {strides = array<i32>} : memref<1x128xf32, #tpu.memory_space<vmem>>, vector<1x128xf32>,
    %cst_25 = arith.constant 1.000000e+00 : f32
    %cst_26 = arith.constant 0.000000e+00 : f32
    %57 = vector.broadcast %cst_25 : f32 to vector<1x128xf32>
    %58 = vector.broadcast %cst_26 : f32 to vector<1x128xf32>
    %59 = arith.select %37, %57, %58 : vector<1x128xi1>, vector<1x128xf32>
    %c0_27 = arith.constant 0 : index
    %c0_28 = arith.constant 0 : index
    %60 = vector.load %arg10[%c0_27, %c0_28] : memref<1x128xf32, #tpu.memory_space<vmem>>, vector<1x128xf32>
    tpu.vector_store %arg10[%c0_27, %c0_28], %59 {strides = array<i32>} : memref<1x128xf32, #tpu.memory_space<vmem>>, vector<1x128xf32>,
    return
  }
  func.func @transform_0(%arg0: i32) -> (i32, i32) {
    %c0_i32 = arith.constant 0 : i32
    %c0_i32_0 = arith.constant 0 : i32
    %c0_i32_1 = arith.constant 0 : i32
    return %c0_i32, %c0_i32_0 : i32, i32
  }
  func.func @transform_1(%arg0: i32) -> (i32, i32) {
    %c0_i32 = arith.constant 0 : i32
    %c0_i32_0 = arith.constant 0 : i32
    return %c0_i32, %arg0 : i32, i32
  }
  func.func @transform_2(%arg0: i32) -> (i32, i32) {
    %c0_i32 = arith.constant 0 : i32
    %c0_i32_0 = arith.constant 0 : i32
    return %c0_i32, %arg0 : i32, i32
  }
  func.func @transform_3(%arg0: i32) -> (i32, i32) {
    %c0_i32 = arith.constant 0 : i32
    %c0_i32_0 = arith.constant 0 : i32
    %c0_i32_1 = arith.constant 0 : i32
    return %c0_i32, %c0_i32_0 : i32, i32
  }
  func.func @transform_4(%arg0: i32) -> (i32, i32) {
    %c0_i32 = arith.constant 0 : i32
    %c0_i32_0 = arith.constant 0 : i32
    %c0_i32_1 = arith.constant 0 : i32
    return %c0_i32, %c0_i32_0 : i32, i32
  }
  func.func @transform_5(%arg0: i32) -> (i32, i32) {
    %c0_i32 = arith.constant 0 : i32
    %c0_i32_0 = arith.constant 0 : i32
    %c0_i32_1 = arith.constant 0 : i32
    return %c0_i32, %c0_i32_0 : i32, i32
  }
  func.func @transform_6(%arg0: i32) -> (i32, i32) {
    %c0_i32 = arith.constant 0 : i32
    %c0_i32_0 = arith.constant 0 : i32
    %c0_i32_1 = arith.constant 0 : i32
    return %c0_i32, %c0_i32_0 : i32, i32
  }
  func.func @transform_7(%arg0: i32) -> (i32, i32) {
    %c0_i32 = arith.constant 0 : i32
    %c0_i32_0 = arith.constant 0 : i32
    return %c0_i32, %arg0 : i32, i32
  }
  func.func @transform_8(%arg0: i32) -> (i32, i32) {
    %c0_i32 = arith.constant 0 : i32
    %c0_i32_0 = arith.constant 0 : i32
    return %c0_i32, %arg0 : i32, i32
  }
  func.func @transform_9(%arg0: i32) -> (i32, i32) {
    %c0_i32 = arith.constant 0 : i32
    %c0_i32_0 = arith.constant 0 : i32
    return %c0_i32, %arg0 : i32, i32
  }
}

module attributes {stable_mosaic.version = 11 : i64} {
  func.func @fma_kernel(%arg0: i32, %arg1: i32, %arg2: memref<8x1xf32, #tpu.memory_space<vmem>>, %arg3: memref<8x1xf32, #tpu.memory_space<vmem>>, %arg4: memref<1x128xf32, #tpu.memory_space<vmem>>, %arg5: memref<1x128xf32, #tpu.memory_space<vmem>>, %arg6: memref<1x128xf32, #tpu.memory_space<vmem>>, %arg7: memref<8x128xf32, #tpu.memory_space<vmem>>) attributes {dimension_semantics = [#tpu.dimension_semantics<parallel>, #tpu.dimension_semantics<parallel>], iteration_bounds = array<i64: 1, 1>, scalar_prefetch = 0 : i64, scratch_operands = 0 : i64, tpu.core_type = #tpu.core_type<tc>, window_params = [{transform_indices = @transform_0, window_bounds = array<i64: 8, 1>}, {transform_indices = @transform_1, window_bounds = array<i64: 8, 1>}, {transform_indices = @transform_2, window_bounds = array<i64: 1, 128>}, {transform_indices = @transform_3, window_bounds = array<i64: 1, 128>}, {transform_indices = @transform_4, window_bounds = array<i64: 1, 128>}, {transform_indices = @transform_5, window_bounds = array<i64: 8, 128>}]} {
    %c0 = arith.constant 0 : index
    %c0_0 = arith.constant 0 : index
    %0 = vector.load %arg2[%c0, %c0_0] : memref<8x1xf32, #tpu.memory_space<vmem>>, vector<8x1xf32>
    %c0_1 = arith.constant 0 : index
    %c0_2 = arith.constant 0 : index
    %1 = vector.load %arg4[%c0_1, %c0_2] : memref<1x128xf32, #tpu.memory_space<vmem>>, vector<1x128xf32>
    %2 = vector.broadcast %0 : vector<8x1xf32> to vector<8x128xf32>
    %3 = vector.broadcast %1 : vector<1x128xf32> to vector<8x128xf32>
    %4 = arith.mulf %2, %3 : vector<8x128xf32>
    %c0_3 = arith.constant 0 : index
    %c0_4 = arith.constant 0 : index
    %5 = vector.load %arg3[%c0_3, %c0_4] : memref<8x1xf32, #tpu.memory_space<vmem>>, vector<8x1xf32>
    %c0_5 = arith.constant 0 : index
    %c0_6 = arith.constant 0 : index
    %6 = vector.load %arg6[%c0_5, %c0_6] : memref<1x128xf32, #tpu.memory_space<vmem>>, vector<1x128xf32>
    %7 = vector.broadcast %5 : vector<8x1xf32> to vector<8x128xf32>
    %8 = vector.broadcast %6 : vector<1x128xf32> to vector<8x128xf32>
    %9 = arith.mulf %7, %8 : vector<8x128xf32>
    %10 = arith.addf %4, %9 : vector<8x128xf32>
    %c0_7 = arith.constant 0 : index
    %c0_8 = arith.constant 0 : index
    %11 = vector.load %arg5[%c0_7, %c0_8] : memref<1x128xf32, #tpu.memory_space<vmem>>, vector<1x128xf32>
    %12 = vector.broadcast %11 : vector<1x128xf32> to vector<8x128xf32>
    %13 = arith.addf %10, %12 : vector<8x128xf32>
    %c0_9 = arith.constant 0 : index
    %c0_10 = arith.constant 0 : index
    %14 = vector.load %arg7[%c0_9, %c0_10] : memref<8x128xf32, #tpu.memory_space<vmem>>, vector<8x128xf32>
    tpu.vector_store %arg7[%c0_9, %c0_10], %13 {strides = array<i32>} : memref<8x128xf32, #tpu.memory_space<vmem>>, vector<8x128xf32>,
    return
  }
  func.func @transform_0(%arg0: i32, %arg1: i32) -> (i32, i32) {
    %c0_i32 = arith.constant 0 : i32
    %c0_i32_0 = arith.constant 0 : i32
    return %arg0, %c0_i32 : i32, i32
  }
  func.func @transform_1(%arg0: i32, %arg1: i32) -> (i32, i32) {
    %c0_i32 = arith.constant 0 : i32
    %c0_i32_0 = arith.constant 0 : i32
    return %arg0, %c0_i32 : i32, i32
  }
  func.func @transform_2(%arg0: i32, %arg1: i32) -> (i32, i32) {
    %c0_i32 = arith.constant 0 : i32
    %c0_i32_0 = arith.constant 0 : i32
    return %c0_i32, %arg1 : i32, i32
  }
  func.func @transform_3(%arg0: i32, %arg1: i32) -> (i32, i32) {
    %c0_i32 = arith.constant 0 : i32
    %c0_i32_0 = arith.constant 0 : i32
    return %c0_i32, %arg1 : i32, i32
  }
  func.func @transform_4(%arg0: i32, %arg1: i32) -> (i32, i32) {
    %c0_i32 = arith.constant 0 : i32
    %c0_i32_0 = arith.constant 0 : i32
    return %c0_i32, %arg1 : i32, i32
  }
  func.func @transform_5(%arg0: i32, %arg1: i32) -> (i32, i32) {
    %c0_i32 = arith.constant 0 : i32
    return %arg0, %arg1 : i32, i32
  }
}

</mosaic_0001>

<bundles_post_ra>
// kernel: _forward_impl.3
= control target key start
LH: loop header
LB: loop body
LE: loop exit
PB: predicated region body
PF: predicated region fallthrough
CT: control target
= control target key end

     0   :  { %v103_v1 = vmov 0   ;;  %s162_s0 = inlined_call_operand.vmem [shape: f32[8,1], index: 0, kind: input, shape index: {}]   ;;  %s163_s1 = inlined_call_operand.vmem [shape: f32[8,1], index: 1, kind: input, shape index: {}]   ;;  %s164_s2 = inlined_call_operand.vmem [shape: f32[1,128], index: 2, kind: input, shape index: {}]   ;;  %s165_s3 = inlined_call_operand.vmem [shape: f32[1,128], index: 3, kind: input, shape index: {}]   ;;  %s166_s4 = inlined_call_operand.vmem [shape: f32[1,128], index: 4, kind: input, shape index: {}]   ;;  %s167_s5 = inlined_call_operand.hbm [shape: f32[8,10], index: 5, kind: output, shape index: {}]  }
   0x1   :  { %v21_v0 = vld [vmem:[%s162_s0] sm:$0xff]  ;;  %78 = vset.pattern.permute.xlu0 %v103_v1 }
   0x2   :  { %10 = vsyncpa [#allocation3], 0  ;;  %25 = vperm.xlu0 %78, %v21_v0   ;;  %v35_v2 = vld [vmem:[%s163_s1] sm:$0xff]  ;;  %s104_s27 = smov [#allocation2]  }
   0x3   :  { %v73_v4 = vld [vmem:[%s164_s2] ss:$0 sm:$0xff]  ;;  %s65_s28 = sshll.u32 %s104_s27, 4  ;;  %s66_s28 = int_to_ptr.vmem [resolvable:$true] %s65_s28 }
   0x4   :  { %v74_v5 = vld [vmem:[%s166_s4] ss:$0 sm:$0xff]  ;;  %s79_s1 = scalar_lea.vmem %s66_s28, 128  ;;  %p84_p1 = scmp.lt.s32.totalorder %s66_s28, %s66_s28 }
   0x5   :  { %v75_v9 = vld [vmem:[%s165_s3] ss:$0 sm:$0xff]  ;;  %p80_p0 = scmp.ne.s32.totalorder %s66_s28, %s79_s1  ;;  %p85_p2 = scmp.lt.s32.totalorder %s79_s1, %s79_s1 }
   0x6   :  { %39 = vperm.xlu0 %78, %v35_v2  }
   0x7   :  { %p86_p3 = por %p85_p2, %p84_p1 }
   0x9   :  { %p87_p4 = pnand %p86_p3, %p80_p0 }
  0x81   :  { %v26_v3 = vpop.permute.xlu0 %25 }
  0x82   :  { %v34_v7 = vmul.f32 %v73_v4, %v26_v3 }
  0x85   :  { %v40_v6 = vpop.permute.xlu0 %39 }
  0x86   :  { %v48_v8 = vmul.f32 %v74_v5, %v40_v6 }
  0x88   :  { %v49_v10 = vadd.f32 %v48_v8, %v34_v7 }
  0x8a   :  { %v57_v11 = vadd.f32 %v75_v9, %v49_v10 }
  0x8c   :  { %58 = vst [vmem:[#allocation2] sm:$0xff] %v57_v11 }
  0x8d   :  { %90 = shalt.err (!%p87_p4)
}
  0x8e   :  { %s91_s29 = scalar_lea.hbm %s167_s5, 128 }
  0x8f   :  { %p92_p5 = scmp.ne.s32.totalorder %s167_s5, %s91_s29  ;;  %p95_p6 = scmp.lt.u32.totalorder %s91_s29, %s167_s5 }
  0x91   :  { %p97_p7 = pnand %p95_p6, %p92_p5 }
  0x93   :  { %100 = shalt.err (!%p97_p7)
}
  0x94   :  { %68 = dma.vmem_to_hbm [thread:$0]  %s66_s28, 128, %s167_s5, [#allocation3]  }
  0x95   :  { %101 = dma.done.wait [#allocation3], 128  }
  0x96   :  { %102 = vsyncadd [#allocation3], 4294967168 }
  0x97   :  { %72 = vsyncpa [#allocation3], 1 }

// kernel: _forward_impl.2
= control target key start
LH: loop header
LB: loop body
LE: loop exit
PB: predicated region body
PF: predicated region fallthrough
CT: control target
= control target key end

     0   :  { %16 = vsyncpa [#allocation4], 0  ;;  %s1039_s0 = inlined_call_operand.<no memory space> [shape: f32[1,1], index: 0, kind: input, shape index: {}]   ;;  %s1040_s1 = inlined_call_operand.vmem [shape: f32[1,128], index: 1, kind: input, shape index: {}]   ;;  %s1041_s2 = inlined_call_operand.vmem [shape: f32[1,128], index: 2, kind: input, shape index: {}]   ;;  %s1042_s3 = inlined_call_operand.hbm [shape: f32[128,1], index: 3, kind: input, shape index: {}]   ;;  %s1043_s4 = inlined_call_operand.hbm [shape: f32[128,1], index: 4, kind: input, shape index: {}]   ;;  %s1044_s5 = inlined_call_operand.hbm [shape: f32[128,1], index: 5, kind: input, shape index: {}]   ;;  %s1045_s6 = inlined_call_operand.hbm [shape: f32[128,1], index: 6, kind: input, shape index: {}]   ;;  %s1046_s7 = inlined_call_operand.vmem [shape: f32[1,128], index: 7, kind: output, shape index: {0}]   ;;  %s1047_s8 = inlined_call_operand.vmem [shape: f32[1,128], index: 8, kind: output, shape index: {1}]   ;;  %s1048_s9 = inlined_call_operand.vmem [shape: f32[1,128], index: 9, kind: output, shape index: {2}]  }
   0x1   :  { %17 = vsyncpa [#allocation6], 0 }
   0x2   :  { %18 = vsyncpa [#allocation9], 0  ;;  %s745_s30 = smov [#allocation5]   ;;  %s746_s11 = smov [#allocation3]  }
   0x3   :  { %s42_s10 = sshll.u32 %s745_s30, 4  ;;  %s30_s12 = sshll.u32 %s746_s11, 4  ;;  %s43_s10 = int_to_ptr.vmem [resolvable:$true] %s42_s10  ;;  %s803_s12 = int_to_ptr.vmem [resolvable:$true] %s30_s12 }
   0x4   :  { %s651_s15 = scalar_lea.hbm %s1043_s4, 2048 }
   0x5   :  { %p652_p0 = scmp.ne.s32.totalorder %s1043_s4, %s651_s15  ;;  %p655_p1 = scmp.lt.u32.totalorder %s651_s15, %s1043_s4 }
   0x7   :  { %p657_p2 = pnand %p655_p1, %p652_p0 }
   0x9   :  { %660 = shalt.err (!%p657_p2)
}
   0xa   :  { %s661_s20 = scalar_lea.vmem %s43_s10, 2048  ;;  %p666_p4 = scmp.lt.s32.totalorder %s43_s10, %s43_s10 }
   0xb   :  { %p662_p3 = scmp.ne.s32.totalorder %s43_s10, %s661_s20  ;;  %p667_p5 = scmp.lt.s32.totalorder %s661_s20, %s661_s20 }
   0xd   :  { %p668_p6 = por %p667_p5, %p666_p4 }
   0xf   :  { %p669_p7 = pnand %p668_p6, %p662_p3 }
  0x11   :  { %672 = shalt.err (!%p669_p7)
}
  0x12   :  { %s747_s21 = smov 128   ;;  %s748_s22 = smov 8  }
  0x13   :  { %48 = dma.hbm_to_vmem [thread:$0]  %s1043_s4, 2048, %s43_s10, [#allocation6], %s747_s21, %s747_s21, %s748_s22  }
  0x14   :  { %s673_s27 = scalar_lea.hbm %s1042_s3, 2048 }
  0x15   :  { %p674_p8 = scmp.ne.s32.totalorder %s1042_s3, %s673_s27  ;;  %p677_p9 = scmp.lt.u32.totalorder %s673_s27, %s1042_s3 }
  0x17   :  { %p679_p10 = pnand %p677_p9, %p674_p8 }
  0x19   :  { %682 = shalt.err (!%p679_p10)
}
  0x1a   :  { %s683_s13 = scalar_lea.vmem %s803_s12, 2048  ;;  %p688_p12 = scmp.lt.s32.totalorder %s803_s12, %s803_s12 }
  0x1b   :  { %p684_p11 = scmp.ne.s32.totalorder %s803_s12, %s683_s13  ;;  %p689_p13 = scmp.lt.s32.totalorder %s683_s13, %s683_s13 }
  0x1d   :  { %p690_p0 = por %p689_p13, %p688_p12 }
  0x1f   :  { %p691_p1 = pnand %p690_p0, %p684_p11 }
  0x21   :  { %694 = shalt.err (!%p691_p1)
}
  0x22   :  { %36 = dma.hbm_to_vmem [thread:$0]  %s1042_s3, 2048, %s803_s12, [#allocation4], %s747_s21, %s747_s21, %s748_s22  }
  0x23   :  { %s749_s14 = smov [#allocation7]   ;;  %s750_s16 = smov [#allocation8]  }
  0x24   :  { %s54_s15 = sshll.u32 %s749_s14, 4  ;;  %s66_s17 = sshll.u32 %s750_s16, 4  ;;  %s55_s15 = int_to_ptr.vmem [resolvable:$true] %s54_s15  ;;  %s840_s17 = int_to_ptr.vmem [resolvable:$true] %s66_s17 }
  0x25   :  { %s695_s20 = scalar_lea.hbm %s1044_s5, 2048 }
  0x26   :  { %p696_p2 = scmp.ne.s32.totalorder %s1044_s5, %s695_s20  ;;  %p699_p3 = scmp.lt.u32.totalorder %s695_s20, %s1044_s5 }
  0x28   :  { %p701_p4 = pnand %p699_p3, %p696_p2 }
  0x2a   :  { %704 = shalt.err (!%p701_p4)
}
  0x2b   :  { %s705_s3 = scalar_lea.vmem %s55_s15, 2048  ;;  %p710_p6 = scmp.lt.s32.totalorder %s55_s15, %s55_s15 }
  0x2c   :  { %p706_p5 = scmp.ne.s32.totalorder %s55_s15, %s705_s3  ;;  %p711_p7 = scmp.lt.s32.totalorder %s705_s3, %s705_s3 }
  0x2e   :  { %p712_p8 = por %p711_p7, %p710_p6 }
  0x30   :  { %p713_p9 = pnand %p712_p8, %p706_p5 }
  0x32   :  { %716 = shalt.err (!%p713_p9)
}
  0x33   :  { %60 = dma.hbm_to_vmem [thread:$0]  %s1044_s5, 2048, %s55_s15, [#allocation6], %s747_s21, %s747_s21, %s748_s22  }
  0x34   :  { %s717_s30 = scalar_lea.hbm %s1045_s6, 2048 }
  0x35   :  { %p718_p10 = scmp.ne.s32.totalorder %s1045_s6, %s717_s30  ;;  %p721_p11 = scmp.lt.u32.totalorder %s717_s30, %s1045_s6 }
  0x37   :  { %p723_p12 = pnand %p721_p11, %p718_p10 }
  0x39   :  { %726 = shalt.err (!%p723_p12)
}
  0x3a   :  { %s727_s14 = scalar_lea.vmem %s840_s17, 2048  ;;  %p732_p0 = scmp.lt.s32.totalorder %s840_s17, %s840_s17 }
  0x3b   :  { %p728_p13 = scmp.ne.s32.totalorder %s840_s17, %s727_s14  ;;  %p733_p1 = scmp.lt.s32.totalorder %s727_s14, %s727_s14 }
  0x3d   :  { %p734_p2 = por %p733_p1, %p732_p0 }
  0x3f   :  { %p735_p3 = pnand %p734_p2, %p728_p13 }
  0x41   :  { %738 = shalt.err (!%p735_p3)
}
  0x42   :  { %72 = dma.hbm_to_vmem [thread:$0]  %s1045_s6, 2048, %s840_s17, [#allocation9], %s747_s21, %s747_s21, %s748_s22  }
  0x43   :  { %739 = dma.done.wait [#allocation4], 2048  }
  0x44   :  { %740 = vsyncadd [#allocation4], 4294965248 }
  0x45   :  { %741 = dma.done.wait [#allocation6], 4096  }
  0x46   :  { %742 = vsyncadd [#allocation6], 4294963200 }
  0x47   :  { %743 = dma.done.wait [#allocation9], 2048  }
  0x48   :  { %744 = vsyncadd [#allocation9], 4294965248  ;;  %v751_v0 = vmov 0   ;;  %v89_v1 = vld [vmem:[#allocation3 + $0x10] sm:$0xff]  ;;  %v87_v2 = vld [vmem:[#allocation3] sm:$0xff]  ;;  %s616_s17 = ssub.f32 1.0, %s1039_s0 }
  0x49   :  { %650 = vset.pattern.permute.xlu1 %v751_v0  ;;  %649 = vset.pattern.permute.xlu0 %v751_v0  ;;  %v90_v3 = vld [vmem:[#allocation3 + $0x18] sm:$0xff]  ;;  %v88_v4 = vld [vmem:[#allocation3 + $0x8] sm:$0xff]  ;;  %v91_v6 = vld [vmem:[#allocation3 + $0x20] sm:$0xff] }
  0x4a   :  { %121 = vperm.xlu1 %650, %v89_v1   ;;  %111 = vperm.xlu0 %649, %v87_v2   ;;  %v92_v5 = vld [vmem:[#allocation3 + $0x28] sm:$0xff]  ;;  %v94_v7 = vld [vmem:[#allocation3 + $0x38] sm:$0xff]  ;;  %v93_v8 = vld [vmem:[#allocation3 + $0x30] sm:$0xff] }
  0x4b   :  { %v96_v9 = vld [vmem:[#allocation3 + $0x48] sm:$0xff]  ;;  %v95_v10 = vld [vmem:[#allocation3 + $0x40] sm:$0xff]  ;;  %v98_v11 = vld [vmem:[#allocation3 + $0x58] sm:$0xff] }
  0x4c   :  { %v97_v12 = vld [vmem:[#allocation3 + $0x50] sm:$0xff]  ;;  %v100_v13 = vld [vmem:[#allocation3 + $0x68] sm:$0xff]  ;;  %v99_v14 = vld [vmem:[#allocation3 + $0x60] sm:$0xff] }
  0x4d   :  { %v102_v15 = vld [vmem:[#allocation3 + $0x78] sm:$0xff]  ;;  %v101_v16 = vld [vmem:[#allocation3 + $0x70] sm:$0xff]  ;;  %v206_v17 = vld [vmem:[#allocation5 + $0x8] sm:$0xff] }
  0x4e   :  { %126 = vperm.xlu1 %650, %v90_v3   ;;  %116 = vperm.xlu0 %649, %v88_v4   ;;  %v205_v18 = vld [vmem:[#allocation5] sm:$0xff]  ;;  %v208_v19 = vld [vmem:[#allocation5 + $0x18] sm:$0xff]  ;;  %v207_v20 = vld [vmem:[#allocation5 + $0x10] sm:$0xff] }
  0x4f   :  { %v210_v21 = vld [vmem:[#allocation5 + $0x28] sm:$0xff]  ;;  %v209_v22 = vld [vmem:[#allocation5 + $0x20] sm:$0xff]  ;;  %v212_v23 = vld [vmem:[#allocation5 + $0x38] sm:$0xff] }
  0x50   :  { %v211_v24 = vld [vmem:[#allocation5 + $0x30] sm:$0xff]  ;;  %v214_v25 = vld [vmem:[#allocation5 + $0x48] sm:$0xff]  ;;  %v213_v26 = vld [vmem:[#allocation5 + $0x40] sm:$0xff] }
  0x51   :  { %v216_v27 = vld [vmem:[#allocation5 + $0x58] sm:$0xff]  ;;  %v215_v28 = vld [vmem:[#allocation5 + $0x50] sm:$0xff]  ;;  %v218_v29 = vld [vmem:[#allocation5 + $0x68] sm:$0xff] }
  0x52   :  { %136 = vperm.xlu1 %650, %v92_v5   ;;  %131 = vperm.xlu0 %649, %v91_v6   ;;  %v217_v30 = vld [vmem:[#allocation5 + $0x60] sm:$0xff]  ;;  %v220_v31 = vld [vmem:[#allocation5 + $0x78] sm:$0xff]  ;;  %v219_v32 = vld [vmem:[#allocation5 + $0x70] sm:$0xff] }
  0x53   :  { %v334_v33 = vld [vmem:[#allocation7 + $0x8] sm:$0xff]  ;;  %v333_v34 = vld [vmem:[#allocation7] sm:$0xff]  ;;  %v336_v35 = vld [vmem:[#allocation7 + $0x18] sm:$0xff] }
  0x54   :  { %v335_v36 = vld [vmem:[#allocation7 + $0x10] sm:$0xff]  ;;  %v467_v37 = vld [vmem:[#allocation8 + $0x8] sm:$0xff]  ;;  %v466_v38 = vld [vmem:[#allocation8] sm:$0xff] }
  0x55   :  { %v469_v39 = vld [vmem:[#allocation8 + $0x18] sm:$0xff]  ;;  %v468_v40 = vld [vmem:[#allocation8 + $0x10] sm:$0xff]  ;;  %v470_v41 = vld [vmem:[#allocation8 + $0x20] sm:$0xff] }
  0x56   :  { %146 = vperm.xlu1 %650, %v94_v7   ;;  %141 = vperm.xlu0 %649, %v93_v8   ;;  %v337_v42 = vld [vmem:[#allocation7 + $0x20] sm:$0xff]  ;;  %v471_v43 = vld [vmem:[#allocation8 + $0x28] sm:$0xff]  ;;  %v472_v45 = vld [vmem:[#allocation8 + $0x30] sm:$0xff]  ;;  %v599_v7 = vlaneseq }
  0x57   :  { %v338_v44 = vld [vmem:[#allocation7 + $0x28] sm:$0xff]  ;;  %v339_v46 = vld [vmem:[#allocation7 + $0x30] sm:$0xff]  ;;  %v473_v47 = vld [vmem:[#allocation8 + $0x38] sm:$0xff] }
  0x58   :  { %v340_v48 = vld [vmem:[#allocation7 + $0x38] sm:$0xff]  ;;  %v474_v49 = vld [vmem:[#allocation8 + $0x40] sm:$0xff]  ;;  %v475_v51 = vld [vmem:[#allocation8 + $0x48] sm:$0xff]  ;;  %v881_v8 = vand.u32 127, %v599_v7 }
  0x59   :  { %v341_v50 = vld [vmem:[#allocation7 + $0x40] sm:$0xff]  ;;  %v342_v52 = vld [vmem:[#allocation7 + $0x48] sm:$0xff]  ;;  %v476_v53 = vld [vmem:[#allocation8 + $0x50] sm:$0xff] }
  0x5a   :  { %156 = vperm.xlu1 %650, %v96_v9   ;;  %151 = vperm.xlu0 %649, %v95_v10   ;;  %v343_v54 = vld [vmem:[#allocation7 + $0x50] sm:$0xff]  ;;  %v477_v55 = vld [vmem:[#allocation8 + $0x58] sm:$0xff]  ;;  %v478_v57 = vld [vmem:[#allocation8 + $0x60] sm:$0xff]  ;;  %vm607_vm0 = vcmp.eq.s32.totalorder %v881_v8, 9  ;;  %vm608_vm1 = vcmp.eq.s32.totalorder %v881_v8, 0 }
  0x5b   :  { %v344_v56 = vld [vmem:[#allocation7 + $0x58] sm:$0xff]  ;;  %v345_v58 = vld [vmem:[#allocation7 + $0x60] sm:$0xff]  ;;  %v479_v59 = vld [vmem:[#allocation8 + $0x68] sm:$0xff] }
  0x5c   :  { %v346_v60 = vld [vmem:[#allocation7 + $0x68] sm:$0xff]  ;;  %v480_v61 = vld [vmem:[#allocation8 + $0x70] sm:$0xff]  ;;  %v481_v63 = vld [vmem:[#allocation8 + $0x78] sm:$0xff] }
  0x5d   :  { %v347_v62 = vld [vmem:[#allocation7 + $0x70] sm:$0xff]  ;;  %v348_v0 = vld [vmem:[#allocation7 + $0x78] sm:$0xff] }
  0x5e   :  { %166 = vperm.xlu1 %650, %v98_v11   ;;  %161 = vperm.xlu0 %649, %v97_v12   ;;  %v752_v11 = vmov 0.0  }
  0x5f   :  { %v889_v12 = vsel %vm607_vm0, 1.0, %v752_v11 }
  0x62   :  { %176 = vperm.xlu1 %650, %v100_v13   ;;  %171 = vperm.xlu0 %649, %v99_v14   ;;  %v623_v13 = vsel %vm608_vm1, 1.0, %v752_v11 }
  0x63   :  { %624 = vst [vmem:[%s1048_s9] sm:$0x1] %v623_v13 }
  0x66   :  { %186 = vperm.xlu1 %650, %v102_v15   ;;  %181 = vperm.xlu0 %649, %v101_v16  }
  0x6a   :  { %228 = vperm.xlu1 %650, %v206_v17   ;;  %223 = vperm.xlu0 %649, %v205_v18  }
  0x6e   :  { %238 = vperm.xlu1 %650, %v208_v19   ;;  %233 = vperm.xlu0 %649, %v207_v20  }
  0x72   :  { %248 = vperm.xlu1 %650, %v210_v21   ;;  %243 = vperm.xlu0 %649, %v209_v22  }
  0x76   :  { %258 = vperm.xlu1 %650, %v212_v23   ;;  %253 = vperm.xlu0 %649, %v211_v24  }
  0x7a   :  { %268 = vperm.xlu1 %650, %v214_v25   ;;  %263 = vperm.xlu0 %649, %v213_v26  }
  0x7e   :  { %278 = vperm.xlu1 %650, %v216_v27   ;;  %273 = vperm.xlu0 %649, %v215_v28  }
  0x82   :  { %288 = vperm.xlu1 %650, %v218_v29   ;;  %283 = vperm.xlu0 %649, %v217_v30  }
  0x86   :  { %298 = vperm.xlu1 %650, %v220_v31   ;;  %293 = vperm.xlu0 %649, %v219_v32  }
  0x8a   :  { %356 = vperm.xlu1 %650, %v334_v33   ;;  %351 = vperm.xlu0 %649, %v333_v34  }
  0x8e   :  { %366 = vperm.xlu1 %650, %v336_v35   ;;  %361 = vperm.xlu0 %649, %v335_v36   ;;  %v929_v36 = vld [vmem:[%s1040_s1] ss:$0 sm:$0xff] }
  0x92   :  { %489 = vperm.xlu1 %650, %v467_v37   ;;  %484 = vperm.xlu0 %649, %v466_v38  }
  0x96   :  { %499 = vperm.xlu1 %650, %v469_v39   ;;  %494 = vperm.xlu0 %649, %v468_v40  }
  0x9a   :  { %504 = vperm.xlu1 %650, %v470_v41   ;;  %371 = vperm.xlu0 %649, %v337_v42  }
  0x9e   :  { %509 = vperm.xlu1 %650, %v471_v43   ;;  %376 = vperm.xlu0 %649, %v338_v44  }
  0xa2   :  { %514 = vperm.xlu1 %650, %v472_v45   ;;  %381 = vperm.xlu0 %649, %v339_v46  }
  0xa6   :  { %519 = vperm.xlu1 %650, %v473_v47   ;;  %386 = vperm.xlu0 %649, %v340_v48  }
  0xaa   :  { %524 = vperm.xlu1 %650, %v474_v49   ;;  %391 = vperm.xlu0 %649, %v341_v50  }
  0xae   :  { %529 = vperm.xlu1 %650, %v475_v51   ;;  %396 = vperm.xlu0 %649, %v342_v52  }
  0xb2   :  { %534 = vperm.xlu1 %650, %v476_v53   ;;  %401 = vperm.xlu0 %649, %v343_v54  }
  0xb6   :  { %539 = vperm.xlu1 %650, %v477_v55   ;;  %406 = vperm.xlu0 %649, %v344_v56  }
  0xba   :  { %544 = vperm.xlu1 %650, %v478_v57   ;;  %411 = vperm.xlu0 %649, %v345_v58  }
  0xbe   :  { %549 = vperm.xlu1 %650, %v479_v59   ;;  %416 = vperm.xlu0 %649, %v346_v60  }
  0xc2   :  { %554 = vperm.xlu1 %650, %v480_v61   ;;  %421 = vperm.xlu0 %649, %v347_v62  }
  0xc6   :  { %559 = vperm.xlu1 %650, %v481_v63   ;;  %426 = vperm.xlu0 %649, %v348_v0  }
  0xc9   :  { %v122_v1 = vpop.permute.xlu1 %121  ;;  %v112_v2 = vpop.permute.xlu0 %111 }
  0xca   :  { %vm189_vm5 = vcmp.gt.f32.partialorder %v929_v36, %v112_v2  ;;  %vm191_vm9 = vcmp.gt.f32.partialorder %v929_v36, %v122_v1 }
  0xcd   :  { %v127_v3 = vpop.permute.xlu1 %126  ;;  %v117_v4 = vpop.permute.xlu0 %116 }
  0xce   :  { %vm190_vm4 = vcmp.gt.f32.partialorder %v929_v36, %v117_v4  ;;  %vm192_vm12 = vcmp.gt.f32.partialorder %v929_v36, %v127_v3 }
  0xd1   :  { %v877_v5 = vpop.permute.xlu1 %136  ;;  %v879_v6 = vpop.permute.xlu0 %131 }
  0xd2   :  { %vm193_vm15 = vcmp.gt.f32.partialorder %v929_v36, %v879_v6 }
  0xd5   :  { %v883_v9 = vpop.permute.xlu1 %146  ;;  %v885_v10 = vpop.permute.xlu0 %141 }
  0xd9   :  { %v891_v14 = vpop.permute.xlu1 %156  ;;  %v893_v15 = vpop.permute.xlu0 %151 }
  0xdd   :  { %v898_v16 = vpop.permute.xlu1 %166  ;;  %v900_v17 = vpop.permute.xlu0 %161 }
  0xe1   :  { %v902_v18 = vpop.permute.xlu1 %176  ;;  %v904_v19 = vpop.permute.xlu0 %171 }
  0xe5   :  { %v906_v20 = vpop.permute.xlu1 %186  ;;  %v908_v21 = vpop.permute.xlu0 %181 }
  0xe9   :  { %v229_v22 = vpop.permute.xlu1 %228  ;;  %v224_v23 = vpop.permute.xlu0 %223 }
  0xea   :  { %vm302_vm2 = vcmp.le.f32.partialorder %v929_v36, %v229_v22  ;;  %vm301_vm3 = vcmp.le.f32.partialorder %v929_v36, %v224_v23 }
  0xeb   :  { %vm939_vm6 = vmand %vm190_vm4, %vm302_vm2  ;;  %vm194_vm2 = vcmp.gt.f32.partialorder %v929_v36, %v877_v5 }
  0xec   :  { %vm943_vm7 = vmand %vm189_vm5, %vm301_vm3  ;;  %vm195_vm5 = vcmp.gt.f32.partialorder %v929_v36, %v885_v10 }
  0xed   :  { %v239_v24 = vpop.permute.xlu1 %238  ;;  %v234_v25 = vpop.permute.xlu0 %233 }
  0xee   :  { %vm303_vm8 = vcmp.le.f32.partialorder %v929_v36, %v234_v25  ;;  %vm304_vm10 = vcmp.le.f32.partialorder %v929_v36, %v239_v24 }
  0xef   :  { %vm954_vm11 = vmand %vm191_vm9, %vm303_vm8  ;;  %vm196_vm8 = vcmp.gt.f32.partialorder %v929_v36, %v883_v9 }
  0xf0   :  { %vm961_vm13 = vmand %vm192_vm12, %vm304_vm10 }
  0xf1   :  { %v249_v26 = vpop.permute.xlu1 %248  ;;  %v244_v27 = vpop.permute.xlu0 %243 }
  0xf2   :  { %vm305_vm14 = vcmp.le.f32.partialorder %v929_v36, %v244_v27  ;;  %vm306_vm1 = vcmp.le.f32.partialorder %v929_v36, %v249_v26 }
  0xf3   :  { %vm321_vm0 = vmand %vm193_vm15, %vm305_vm14  ;;  %vm198_vm14 = vcmp.gt.f32.partialorder %v929_v36, %v891_v14 }
  0xf4   :  { %vm322_vm3 = vmand %vm194_vm2, %vm306_vm1  ;;  %vm199_vm1 = vcmp.gt.f32.partialorder %v929_v36, %v900_v17 }
  0xf5   :  { %v910_v28 = vpop.permute.xlu1 %258  ;;  %v912_v29 = vpop.permute.xlu0 %253 }
  0xf6   :  { %vm307_vm4 = vcmp.le.f32.partialorder %v929_v36, %v912_v29 }
  0xf9   :  { %v914_v30 = vpop.permute.xlu1 %268  ;;  %v916_v31 = vpop.permute.xlu0 %263 }
  0xfa   :  { %vm309_vm10 = vcmp.le.f32.partialorder %v929_v36, %v916_v31 }
  0xfd   :  { %v918_v32 = vpop.permute.xlu1 %278  ;;  %v920_v33 = vpop.permute.xlu0 %273 }
 0x101   :  { %v922_v34 = vpop.permute.xlu1 %288  ;;  %v924_v35 = vpop.permute.xlu0 %283 }
 0x105   :  { %v932_v37 = vpop.permute.xlu1 %298  ;;  %v934_v38 = vpop.permute.xlu0 %293 }
 0x109   :  { %v357_v40 = vpop.permute.xlu1 %356  ;;  %v352_v41 = vpop.permute.xlu0 %351 }
 0x10a   :  { %v430_v43 = vsel %vm939_vm6, %v357_v40, 0.0  ;;  %v429_v44 = vsel %vm943_vm7, %v352_v41, 0.0 }
 0x10b   :  { %v445_v45 = vadd.f32 %v430_v43, %v429_v44 }
 0x10d   :  { %v367_v46 = vpop.permute.xlu1 %366  ;;  %v362_v47 = vpop.permute.xlu0 %361 }
 0x10e   :  { %v431_v49 = vsel %vm954_vm11, %v362_v47, 0.0  ;;  %v432_v52 = vsel %vm961_vm13, %v367_v46, 0.0 }
 0x10f   :  { %v446_v51 = vadd.f32 %v445_v45, %v431_v49 }
 0x111   :  { %v490_v53 = vpop.permute.xlu1 %489  ;;  %v485_v54 = vpop.permute.xlu0 %484  ;;  %v447_v55 = vadd.f32 %v446_v51, %v432_v52 }
 0x112   :  { %v563_v56 = vsel %vm939_vm6, %v490_v53, 0.0  ;;  %v562_v57 = vsel %vm943_vm7, %v485_v54, 0.0  ;;  %vm323_vm6 = vmand %vm195_vm5, %vm307_vm4  ;;  %vm308_vm7 = vcmp.le.f32.partialorder %v929_v36, %v910_v28  ;;  %vm200_vm4 = vcmp.gt.f32.partialorder %v929_v36, %v898_v16 }
 0x113   :  { %v578_v58 = vadd.f32 %v563_v56, %v562_v57  ;;  %vm324_vm9 = vmand %vm196_vm8, %vm308_vm7  ;;  %vm201_vm7 = vcmp.gt.f32.partialorder %v929_v36, %v904_v19 }
 0x115   :  { %v500_v59 = vpop.permute.xlu1 %499  ;;  %v495_v60 = vpop.permute.xlu0 %494 }
 0x116   :  { %v564_v61 = vsel %vm954_vm11, %v495_v60, 0.0  ;;  %v565_v63 = vsel %vm961_vm13, %v500_v59, 0.0  ;;  %vm197_vm11 = vcmp.gt.f32.partialorder %v929_v36, %v893_v15  ;;  %vm310_vm13 = vcmp.le.f32.partialorder %v929_v36, %v914_v30 }
 0x117   :  { %v579_v62 = vadd.f32 %v578_v58, %v564_v61  ;;  %vm325_vm12 = vmand %vm197_vm11, %vm309_vm10  ;;  %vm202_vm10 = vcmp.gt.f32.partialorder %v929_v36, %v902_v18 }
 0x118   :  { %vm326_vm15 = vmand %vm198_vm14, %vm310_vm13  ;;  %vm203_vm13 = vcmp.gt.f32.partialorder %v929_v36, %v908_v21 }
 0x119   :  { %v505_v0 = vpop.permute.xlu1 %504  ;;  %v580_v1 = vadd.f32 %v579_v62, %v565_v63  ;;  %v372_v2 = vpop.permute.xlu0 %371 }
 0x11a   :  { %v566_v3 = vsel %vm321_vm0, %v505_v0, 0.0  ;;  %v433_v4 = vsel %vm321_vm0, %v372_v2, 0.0  ;;  %vm311_vm0 = vcmp.le.f32.partialorder %v929_v36, %v920_v33 }
 0x11b   :  { %v581_v7 = vadd.f32 %v580_v1, %v566_v3  ;;  %v448_v11 = vadd.f32 %v447_v55, %v433_v4  ;;  %vm327_vm2 = vmand %vm199_vm1, %vm311_vm0  ;;  %vm204_vm0 = vcmp.gt.f32.partialorder %v929_v36, %v906_v20  ;;  %v617_v20 = vld [vmem:[%s1041_s2] sm:$0x1] }
 0x11d   :  { %v510_v13 = vpop.permute.xlu1 %509  ;;  %v377_v22 = vpop.permute.xlu0 %376 }
 0x11e   :  { %v567_v6 = vsel %vm322_vm3, %v510_v13, 0.0  ;;  %v434_v23 = vsel %vm322_vm3, %v377_v22, 0.0  ;;  %vm312_vm3 = vcmp.le.f32.partialorder %v929_v36, %v918_v32 }
 0x11f   :  { %v582_v24 = vadd.f32 %v581_v7, %v567_v6  ;;  %v449_v25 = vadd.f32 %v448_v11, %v434_v23  ;;  %vm328_vm5 = vmand %vm200_vm4, %vm312_vm3  ;;  %vm605_vm3 = vcmp.le.s32.totalorder %v881_v8, 8 }
 0x121   :  { %v515_v26 = vpop.permute.xlu1 %514  ;;  %v382_v27 = vpop.permute.xlu0 %381 }
 0x122   :  { %v568_v5 = vsel %vm323_vm6, %v515_v26, 0.0  ;;  %v435_v39 = vsel %vm323_vm6, %v382_v27, 0.0  ;;  %vm313_vm6 = vcmp.le.f32.partialorder %v929_v36, %v924_v35 }
 0x123   :  { %v583_v40 = vadd.f32 %v582_v24, %v568_v5  ;;  %v450_v41 = vadd.f32 %v449_v25, %v435_v39  ;;  %vm329_vm8 = vmand %vm201_vm7, %vm313_vm6 }
 0x125   :  { %v520_v29 = vpop.permute.xlu1 %519  ;;  %v387_v42 = vpop.permute.xlu0 %386 }
 0x126   :  { %v569_v10 = vsel %vm324_vm9, %v520_v29, 0.0  ;;  %v436_v43 = vsel %vm324_vm9, %v387_v42, 0.0  ;;  %vm314_vm9 = vcmp.le.f32.partialorder %v929_v36, %v922_v34 }
 0x127   :  { %v584_v44 = vadd.f32 %v583_v40, %v569_v10  ;;  %v451_v45 = vadd.f32 %v450_v41, %v436_v43  ;;  %vm330_vm11 = vmand %vm202_vm10, %vm314_vm9 }
 0x129   :  { %v525_v28 = vpop.permute.xlu1 %524  ;;  %v392_v46 = vpop.permute.xlu0 %391 }
 0x12a   :  { %v570_v9 = vsel %vm325_vm12, %v525_v28, 0.0  ;;  %v437_v47 = vsel %vm325_vm12, %v392_v46, 0.0  ;;  %vm315_vm12 = vcmp.le.f32.partialorder %v929_v36, %v934_v38 }
 0x12b   :  { %v585_v48 = vadd.f32 %v584_v44, %v570_v9  ;;  %v452_v49 = vadd.f32 %v451_v45, %v437_v47  ;;  %vm331_vm14 = vmand %vm203_vm13, %vm315_vm12  ;;  %v609_v44 = vstv %s1039_s0 }
 0x12d   :  { %v530_v31 = vpop.permute.xlu1 %529  ;;  %v397_v50 = vpop.permute.xlu0 %396 }
 0x12e   :  { %v571_v15 = vsel %vm326_vm15, %v530_v31, 0.0  ;;  %v438_v51 = vsel %vm326_vm15, %v397_v50, 0.0  ;;  %vm316_vm15 = vcmp.le.f32.partialorder %v929_v36, %v932_v37  ;;  %v618_v36 = vstv %s616_s17 }
 0x12f   :  { %v586_v52 = vadd.f32 %v585_v48, %v571_v15  ;;  %v453_v53 = vadd.f32 %v452_v49, %v438_v51  ;;  %vm332_vm1 = vmand %vm204_vm0, %vm316_vm15  ;;  %v619_v45 = vmul.f32 %v618_v36, %v617_v20 }
 0x131   :  { %v535_v30 = vpop.permute.xlu1 %534  ;;  %v402_v54 = vpop.permute.xlu0 %401 }
 0x132   :  { %v572_v14 = vsel %vm327_vm2, %v535_v30, 0.0  ;;  %v439_v55 = vsel %vm327_vm2, %v402_v54, 0.0  ;;  %vm604_vm2 = vcmp.ge.s32.totalorder %v881_v8, 1 }
 0x133   :  { %v587_v56 = vadd.f32 %v586_v52, %v572_v14  ;;  %v454_v57 = vadd.f32 %v453_v53, %v439_v55  ;;  %vm606_vm4 = vmand %vm604_vm2, %vm605_vm3 }
 0x135   :  { %v540_v33 = vpop.permute.xlu1 %539  ;;  %v407_v58 = vpop.permute.xlu0 %406 }
 0x136   :  { %v573_v17 = vsel %vm328_vm5, %v540_v33, 0.0  ;;  %v440_v59 = vsel %vm328_vm5, %v407_v58, 0.0 }
 0x137   :  { %v588_v60 = vadd.f32 %v587_v56, %v573_v17  ;;  %v455_v61 = vadd.f32 %v454_v57, %v440_v59 }
 0x139   :  { %v545_v32 = vpop.permute.xlu1 %544  ;;  %v412_v62 = vpop.permute.xlu0 %411 }
 0x13a   :  { %v574_v16 = vsel %vm329_vm8, %v545_v32, 0.0  ;;  %v441_v63 = vsel %vm329_vm8, %v412_v62, 0.0 }
 0x13b   :  { %v589_v0 = vadd.f32 %v588_v60, %v574_v16  ;;  %v456_v1 = vadd.f32 %v455_v61, %v441_v63 }
 0x13d   :  { %v550_v35 = vpop.permute.xlu1 %549  ;;  %v417_v2 = vpop.permute.xlu0 %416 }
 0x13e   :  { %v575_v19 = vsel %vm330_vm11, %v550_v35, 0.0  ;;  %v442_v3 = vsel %vm330_vm11, %v417_v2, 0.0 }
 0x13f   :  { %v590_v4 = vadd.f32 %v589_v0, %v575_v19  ;;  %v457_v7 = vadd.f32 %v456_v1, %v442_v3 }
 0x141   :  { %v555_v34 = vpop.permute.xlu1 %554  ;;  %v422_v11 = vpop.permute.xlu0 %421 }
 0x142   :  { %v576_v18 = vsel %vm331_vm14, %v555_v34, 0.0  ;;  %v443_v13 = vsel %vm331_vm14, %v422_v11, 0.0 }
 0x143   :  { %v591_v22 = vadd.f32 %v590_v4, %v576_v18  ;;  %v458_v6 = vadd.f32 %v457_v7, %v443_v13 }
 0x145   :  { %v560_v38 = vpop.permute.xlu1 %559  ;;  %v427_v23 = vpop.permute.xlu0 %426 }
 0x146   :  { %v577_v24 = vsel %vm332_vm1, %v560_v38, 0.0  ;;  %v444_v25 = vsel %vm332_vm1, %v427_v23, 0.0 }
 0x147   :  { %v592_v26 = vadd.f32 %v591_v22, %v577_v24  ;;  %v459_v21 = vadd.f32 %v458_v6, %v444_v25 }
 0x149   :  { %v593_v27 = vrot.slane %v592_v26, 4  ;;  %v460_v5 = vrot.slane %v459_v21, 4 }
 0x14b   :  { %v594_v39 = vadd.f32 %v593_v27, %v592_v26  ;;  %v461_v40 = vadd.f32 %v460_v5, %v459_v21 }
 0x14d   :  { %v595_v37 = vrot.slane %v594_v39, 2  ;;  %v462_v41 = vrot.slane %v461_v40, 2 }
 0x14f   :  { %v596_v29 = vadd.f32 %v595_v37, %v594_v39  ;;  %v463_v42 = vadd.f32 %v462_v41, %v461_v40 }
 0x151   :  { %v597_v10 = vrot.slane %v596_v29, 1  ;;  %v464_v43 = vrot.slane %v463_v42, 1 }
 0x153   :  { %v598_v28 = vadd.f32 %v597_v10, %v596_v29  ;;  %v465_v46 = vadd.f32 %v464_v43, %v463_v42 }
 0x155   :  { %v615_v9 = vmul.f32 %v609_v44, %v598_v28  ;;  %v610_v47 = vmul.f32 %v609_v44, %v465_v46 }
 0x157   :  { %v620_v48 = vadd.f32 %v619_v45, %v615_v9  ;;  %v611_v49 = vsel %vm606_vm4, %v610_v47, 0.0 }
 0x158   :  { %v613_v31 = vadd.f32 %v889_v12, %v611_v49 }
 0x159   :  { %v621_v50 = vsel %vm606_vm4, %v620_v48, 0.0 }
 0x15a   :  { %614 = vst [vmem:[%s1046_s7] sm:$0x1] %v613_v31  ;;  %622 = vst [vmem:[%s1047_s8] sm:$0x1] %v621_v50 }
 0x15b   :  { %637 = vsyncpa [#allocation4], 1 }
 0x15c   :  { %638 = vsyncpa [#allocation6], 1 }
 0x15d   :  { %639 = vsyncpa [#allocation9], 1 }

</bundles_post_ra>
